<compile_context>
chip_gen: v7x
topology: tpu7x:2x2x1
jax: 0.10.0
libtpu: 0.0.40
codegen_flags: <defaults>
</compile_context>

<pallas_src>
import jax
import jax.numpy as jnp
from jax.experimental import pallas as pl
from jax.experimental.pallas import tpu as pltpu

_LANE = 128                  # vreg lane width
_BLOCK_ROWS = 8192           # 8192 x 128 f32 = 4 MiB per block
_SMALL_N_THRESHOLD = 1 << 16 # below this, plain fused XLA wins over pallas_call overhead


def _linreg_kernel(ab_ref, x_ref, o_ref):
    # ab_ref: (2,) f32 in SMEM holding [a, b];  x_ref/o_ref: (block_rows, 128) f32 in VMEM.
    a = ab_ref[0]
    b = ab_ref[1]
    o_ref[...] = a + b * x_ref[...]   # 1 vmul + 1 vadd on the VPU, unmasked lane-dense store


def manual_linear_regression(x, a, b, *, force_pallas=False):
    """y = a + b * x with the same broadcasting semantics as the nn.Module."""
    x = jnp.asarray(x, dtype=jnp.float32)
    a = jnp.asarray(a, dtype=jnp.float32).reshape(())
    b = jnp.asarray(b, dtype=jnp.float32).reshape(())
    orig_shape = x.shape
    n = x.size

    # Small-N (and empty) fallback: one fused XLA FMA, no layout plumbing.
    if n == 0 or (n < _SMALL_N_THRESHOLD and not force_pallas):
        return a + b * x

    flat = x.reshape(-1)

    # Lane-dense (rows, 128) f32 view.  Zero-copy when n is lane-aligned; otherwise
    # pad only the <128-element tail (never to a full block multiple).
    if n % _LANE == 0:
        padded_n = n
        x2d = flat.reshape(-1, _LANE)
    else:
        padded_n = pl.cdiv(n, _LANE) * _LANE
        x2d = jnp.pad(flat, (0, padded_n - n)).reshape(-1, _LANE)
    rows = padded_n // _LANE

    if rows <= _BLOCK_ROWS:
        block_rows = rows            # single full-array block (exempt from (8,128) rule)
    else:
        block_rows = _BLOCK_ROWS     # 4 MiB tiles; last block may be partial (masked)
    grid = (pl.cdiv(rows, block_rows),)

    ab = jnp.stack([a, b])           # (2,) scalar operand -> SMEM

    y2d = pl.pallas_call(
        _linreg_kernel,
        out_shape=jax.ShapeDtypeStruct((rows, _LANE), jnp.float32),
        grid=grid,
        in_specs=[
            pl.BlockSpec(memory_space=pltpu.MemorySpace.SMEM),     # [a, b]
            pl.BlockSpec((block_rows, _LANE), lambda i: (i, 0)),   # x tile
        ],
        out_specs=pl.BlockSpec((block_rows, _LANE), lambda i: (i, 0)),
        compiler_params=pltpu.CompilerParams(
            # Mem-bound elementwise op: shard the grid across both TCs on v7x
            # (measured-neutral on single-TC v5e/v6e).
            dimension_semantics=("parallel",),
            # 4 MiB blocks x 2 arrays x 2 buffers = 16 MiB + headroom.
            vmem_limit_bytes=32 << 20,
        ),
    )(ab, x2d)

    if padded_n == n:
        return y2d.reshape(orig_shape)          # free reshape, no slice/copy
    return y2d.reshape(-1)[:n].reshape(orig_shape)


if __name__ == "__main__":
    key = jax.random.PRNGKey(0)
    kx, ka, kb = jax.random.split(key, 3)

    # Match the PyTorch script: x ~ rand(100, 1), a ~ randn(1), b ~ randn(1)
    x = jax.random.uniform(kx, (100, 1), dtype=jnp.float32)
    a = jax.random.normal(ka, (1,), dtype=jnp.float32)
    b = jax.random.normal(kb, (1,), dtype=jnp.float32)

    # 1) Tutorial shape: small-N path (fused XLA fallback).
    y = jax.block_until_ready(manual_linear_regression(x, a, b))
    y_ref = a + b * x
    assert y.shape == x.shape and y.dtype == jnp.float32
    assert jnp.allclose(y, y_ref, atol=1e-6, rtol=1e-6)

    # 2) Same shape, forced through the Pallas kernel (single full-array block).
    y_p = jax.block_until_ready(manual_linear_regression(x, a, b, force_pallas=True))
    assert jnp.allclose(y_p, y_ref, atol=1e-6, rtol=1e-6)

    # 3) Large lane- and block-aligned input: zero-copy wrapper, grid of 2 parallel blocks.
    x_big = jax.random.uniform(kx, (2 * _BLOCK_ROWS * _LANE, 1), dtype=jnp.float32)
    y_big = jax.block_until_ready(manual_linear_regression(x_big, a, b))
    assert jnp.allclose(y_big, a + b * x_big, atol=1e-6, rtol=1e-6)

    # 4) Ragged input: tail-only pad + unpad slice, single block.
    x_rag = jax.random.uniform(kx, (70_001, 1), dtype=jnp.float32)
    y_rag = jax.block_until_ready(manual_linear_regression(x_rag, a, b))
    assert jnp.allclose(y_rag, a + b * x_rag, atol=1e-6, rtol=1e-6)

    print("KERNEL_OK")
</pallas_src>

<mosaic_0001>
module attributes {stable_mosaic.version = 11 : i64} {
  func.func @_linreg_kernel(%arg0: i32, %arg1: memref<2xf32, #tpu.memory_space<smem>>, %arg2: memref<1x128xf32, #tpu.memory_space<vmem>>, %arg3: memref<1x128xf32, #tpu.memory_space<vmem>>) attributes {dimension_semantics = [#tpu.dimension_semantics<parallel>], iteration_bounds = array<i64: 1>, scalar_prefetch = 0 : i64, scratch_operands = 0 : i64, tpu.core_type = #tpu.core_type<tc>, window_params = [{transform_indices = @transform_0, window_bounds = array<i64: 2>}, {transform_indices = @transform_1, window_bounds = array<i64: 1, 128>}, {transform_indices = @transform_2, window_bounds = array<i64: 1, 128>}]} {
    %c0 = arith.constant 0 : index
    %0 = memref.load %arg1[%c0] : memref<2xf32, #tpu.memory_space<smem>>
    %c1 = arith.constant 1 : index
    %1 = memref.load %arg1[%c1] : memref<2xf32, #tpu.memory_space<smem>>
    %c0_0 = arith.constant 0 : index
    %c0_1 = arith.constant 0 : index
    %2 = vector.load %arg2[%c0_0, %c0_1] : memref<1x128xf32, #tpu.memory_space<vmem>>, vector<1x128xf32>
    %3 = vector.broadcast %1 : f32 to vector<1x128xf32>
    %4 = arith.mulf %3, %2 : vector<1x128xf32>
    %5 = vector.broadcast %0 : f32 to vector<1x128xf32>
    %6 = arith.addf %5, %4 : vector<1x128xf32>
    %c0_2 = arith.constant 0 : index
    %c0_3 = arith.constant 0 : index
    %7 = vector.load %arg3[%c0_2, %c0_3] : memref<1x128xf32, #tpu.memory_space<vmem>>, vector<1x128xf32>
    tpu.vector_store %arg3[%c0_2, %c0_3], %6 {strides = array<i32>} : memref<1x128xf32, #tpu.memory_space<vmem>>, vector<1x128xf32>,
    return
  }
  func.func @transform_0(%arg0: i32) -> i32 {
    %c0_i32 = arith.constant 0 : i32
    %c0_i32_0 = arith.constant 0 : i32
    return %c0_i32 : i32
  }
  func.func @transform_1(%arg0: i32) -> (i32, i32) {
    %c0_i32 = arith.constant 0 : i32
    %c0_i32_0 = arith.constant 0 : i32
    return %arg0, %c0_i32 : i32, i32
  }
  func.func @transform_2(%arg0: i32) -> (i32, i32) {
    %c0_i32 = arith.constant 0 : i32
    %c0_i32_0 = arith.constant 0 : i32
    return %arg0, %c0_i32 : i32, i32
  }
}

</mosaic_0001>

<bundles_post_ra>
// kernel: tpu_custom_call.1
= control target key start
LH: loop header
LB: loop body
LE: loop exit
PB: predicated region body
PF: predicated region fallthrough
CT: control target
= control target key end

     0   :  { %7 = vsyncpa [#allocation4], 0  ;;  %s129_s0 = inlined_call_operand.hbm [shape: f32[2], index: 0, kind: input, shape index: {}]   ;;  %s130_s1 = inlined_call_operand.vmem [shape: f32[1,128], index: 1, kind: input, shape index: {}]   ;;  %s131_s2 = inlined_call_operand.hbm [shape: f32[1,128], index: 2, kind: output, shape index: {}]  }
   0x1   :  { %8 = vsyncpa [#allocation3], 0  ;;  %s49_s11 = scalar_lea.hbm %s129_s0, 16 }
   0x2   :  { %p50_p0 = scmp.ne.s32.totalorder %s129_s0, %s49_s11  ;;  %p53_p1 = scmp.lt.u32.totalorder %s49_s11, %s129_s0 }
   0x4   :  { %p55_p2 = pnand %p53_p1, %p50_p0 }
   0x6   :  { %58 = shalt.err (!%p55_p2)
}
   0x7   :  { %s85_s16 = smov [#allocation2]  }
   0x8   :  { %16 = dma.hbm_to_smem %s129_s0, 16, %s85_s16, [#allocation4]  }
   0x9   :  { %81 = dma.done.wait [#allocation4], 16  }
   0xa   :  { %82 = vsyncadd [#allocation4], 4294967280 }
   0xb   :  { %22 = sfence }
   0xc   :  { %s23_s19 = sld [smem:[#allocation2]]  ;;  %s46_s20 = sld [smem:[#allocation2 + $0x1]]  ;;  %v25_v0 = vld [vmem:[%s130_s1] sm:$0x1] }
   0xd   :  { %s86_s23 = smov [#allocation5]  }
   0xe   :  { %s37_s24 = sshll.u32 %s86_s23, 4  ;;  %s38_s24 = int_to_ptr.vmem [resolvable:$true] %s37_s24 }
   0xf   :  { %s59_s25 = scalar_lea.vmem %s38_s24, 16  ;;  %s63_s0 = scalar_lea.vmem %s38_s24, 32 }
  0x10   :  { %p60_p3 = scmp.ne.s32.totalorder %s38_s24, %s59_s25  ;;  %p64_p4 = scmp.lt.s32.totalorder %s38_s24, %s38_s24 }
  0x11   :  { %p65_p5 = scmp.lt.s32.totalorder %s63_s0, %s59_s25 }
  0x12   :  { %v26_v1 = vstv %s46_s20  ;;  %v28_v2 = vstv %s23_s19 }
  0x13   :  { %v27_v3 = vmul.f32 %v26_v1, %v25_v0  ;;  %p66_p6 = por %p65_p5, %p64_p4 }
  0x15   :  { %v29_v4 = vadd.f32 %v28_v2, %v27_v3  ;;  %p67_p7 = pnand %p66_p6, %p60_p3 }
  0x17   :  { %30 = vst [vmem:[#allocation5] sm:$0x1] %v29_v4 }
  0x18   :  { %70 = shalt.err (!%p67_p7)
}
  0x19   :  { %s71_s1 = scalar_lea.hbm %s131_s2, 16 }
  0x1a   :  { %p72_p8 = scmp.ne.s32.totalorder %s131_s2, %s71_s1  ;;  %p75_p9 = scmp.lt.u32.totalorder %s71_s1, %s131_s2 }
  0x1c   :  { %p77_p10 = pnand %p75_p9, %p72_p8 }
  0x1e   :  { %80 = shalt.err (!%p77_p10)
}
  0x1f   :  { %40 = dma.vmem_to_hbm [thread:$0]  %s38_s24, 16, %s131_s2, [#allocation3]  }
  0x20   :  { %83 = dma.done.wait [#allocation3], 16  }
  0x21   :  { %84 = vsyncadd [#allocation3], 4294967280 }
  0x22   :  { %44 = vsyncpa [#allocation3], 1 }
  0x23   :  { %45 = vsyncpa [#allocation4], 1 }

</bundles_post_ra>
